<compile_context>
chip_gen: v7x
topology: tpu7x:2x2x1
jax: 0.10.0
libtpu: 0.0.40
codegen_flags: <defaults>
</compile_context>

<pallas_src>
import math

import jax
import jax.numpy as jnp
from jax.experimental import pallas as pl
from jax.experimental.pallas import tpu as pltpu


# ----------------------------------------------------------------------------- utilities

def _round_up(x, m):
    return (x + m - 1) // m * m


def _vmem_capacity_bytes():
    """Physical per-core VMEM, best effort (v5e/v6e: 128 MiB, v7x: 64 MiB/TC)."""
    try:
        cap = int(pltpu.get_tpu_info().vmem_capacity_bytes)
        if cap > 0:
            return cap
    except Exception:
        pass
    return 128 * 1024 * 1024


def _generation_block_budget():
    """(target, cap, scoped_budget) for the hidden block, tuned by TPU generation.

    v7x (64 MiB/TC, ~3.2 TB/s HBM): ~6-8 MiB blocks amortize the ~0.35us/step overhead.
    v5e/v6e (128 MiB VMEM): 2-4 MiB blocks already sit at the HBM roofline knee
    (v5e vs v6e cannot be told apart by VMEM size alone; 2-4 MiB is fine for both).
    """
    vmem_cap = _vmem_capacity_bytes()
    if vmem_cap <= 80 * 1024 * 1024:          # v7x-class part (64 MiB / TensorCore)
        target, cap = 6 << 20, 8 << 20
    else:                                      # v5e / v6e class part (128 MiB)
        target, cap = 2 << 20, 4 << 20
    scoped_budget = max(16 << 20, min(40 << 20, vmem_cap * 5 // 8))
    return target, cap, scoped_budget


def _choose_batch_tile(B, row_bytes, *, target, cap):
    """TB divides B; prefer >= 2 grid steps (ideally >= 4 and even) and a padded hidden
    block close to `target` (never above `cap` if avoidable)."""
    cands = [d for d in range(1, B + 1) if B % d == 0 and B // d >= 2]
    if not cands:
        return B                               # B == 1: nothing to pipeline over batch
    scored = []
    for tb in cands:
        n = B // tb
        blk = tb * row_bytes
        scored.append((
            0 if blk <= cap else 1,            # stay under the cap
            0 if blk >= target else 1,         # big enough to amortize per-step overhead
            0 if n % 2 == 0 else 1,            # even step count (v7x megacore balance)
            0 if n >= 4 else 1,                # enough steps to pipeline well
            abs(blk - target),                 # closest to target
            tb,
        ))
    scored.sort()
    return scored[0][-1]


def _choose_seq_tile(S, lane_bytes, *, target, cap):
    """TS divides S, TS % 8 == 0, S // TS >= 2; padded hidden chunk close to `target`."""
    cands = [t for t in range(8, S, 8) if S % t == 0]
    if not cands:
        return None
    scored = []
    for t in cands:
        blk = t * lane_bytes
        scored.append((
            0 if blk <= cap else 1,
            0 if blk >= target else 1,
            abs(blk - target),
            t,
        ))
    scored.sort()
    return scored[0][-1]


def _batch_vmem_need(TB, S, D):
    """(8,128)-padding-aware, double-buffered VMEM bytes for the batch-tiled path."""
    hid = TB * _round_up(S, 8) * _round_up(D, 128) * 4      # (TB, S, D) f32 hidden block
    w = 8 * _round_up(D, 128) * 4                           # (1, D) f32 weight block
    msk = TB * 32 * _round_up(S, 128)                       # (TB, 1, S) int8 mask block
    out = TB * 8 * _round_up(S, 128) * 4                    # (TB, 1, S) f32 output block
    return 2 * (hid + w + msk + out)


def _seq_vmem_need(TS, n_s, D):
    """(8,128)-padding-aware, double-buffered VMEM bytes for the sequence-blocked path."""
    hid = _round_up(TS, 8) * _round_up(D, 128) * 4          # (1, TS, D) f32 hidden chunk
    w = 8 * _round_up(D, 128) * 4                           # (1, D) f32 weight block
    msk = n_s * 32 * _round_up(TS, 128)                     # (n_s, 1, TS) int8 mask block
    out = n_s * 8 * _round_up(TS, 128) * 4                  # (n_s, 1, TS) f32 output block
    sc = n_s * 8 * _round_up(TS, 128) * 4                   # scores scratch
    return 2 * (hid + w + msk + out) + sc


# ----------------------------------------------------------------------------- kernels

# TODO(synk): for D < 128 (e.g. the demo D=32) the hidden vregs are only D/128 lane-occupied;
# a wrapper-side (B, S, D) -> (B, S/k, k*D) lane-densification (k = 128/D) would shrink the
# VPU/XLU work and VMEM padding by 128/D, but is intentionally omitted to keep lowering simple.

def _dot_attention_kernel(h_ref, w_ref, m_ref, o_ref):
    # h_ref: (TB, S, D) f32 hidden block (native layout)
    # w_ref: (1, D)     f32 weight, pre-scaled by 1/sqrt(D), shared across the grid
    # m_ref: (TB, 1, S) int8 mask (nonzero -> masked out)
    # o_ref: (TB, 1, S) f32 softmax weights
    h = h_ref[...]
    w = w_ref[...]
    scores = jnp.sum(h * w[None, :, :], axis=-1)          # (TB, S)   VPU mul + reduce over D
    scores = scores[:, None, :]                           # (TB, 1, S)
    mf = m_ref[...].astype(jnp.float32)                   # (TB, 1, S)
    scores = jnp.where(mf != 0, -jnp.inf, scores)
    mx = jnp.max(scores, axis=-1, keepdims=True)          # per-row max
    e = jnp.exp(scores - mx)
    den = jnp.sum(e, axis=-1, keepdims=True)
    o_ref[...] = (e / den).astype(o_ref.dtype)            # exact normalization (free: HBM-bound)


def _dot_attention_seq_kernel(h_ref, w_ref, m_ref, o_ref, sc_ref):
    # Sequence-blocked path (one batch row per block, S split over the inner grid axis).
    # h_ref: (1, TS, D) f32; w_ref: (1, D) f32; m_ref: (n_s, 1, TS) int8
    # o_ref: (n_s, 1, TS) f32 (resident across the s axis); sc_ref: (n_s, 1, TS) f32 scratch
    s_idx = pl.program_id(1)
    part = jnp.sum(h_ref[...] * w_ref[...][None, :, :], axis=-1)   # (1, TS) raw scores chunk
    sc_ref[s_idx] = part                                           # stash chunk s of this row

    @pl.when(s_idx == pl.num_programs(1) - 1)
    def _finalize():
        mf = m_ref[...].astype(jnp.float32)                        # (n_s, 1, TS)
        scores = jnp.where(mf != 0, -jnp.inf, sc_ref[...])
        mx = jnp.max(scores, axis=-1, keepdims=True)               # (n_s, 1, 1)
        mx = jnp.max(mx, axis=0, keepdims=True)                    # (1, 1, 1) row max
        e = jnp.exp(scores - mx)
        den = jnp.sum(e, axis=-1, keepdims=True)
        den = jnp.sum(den, axis=0, keepdims=True)                  # (1, 1, 1) row denom
        o_ref[...] = (e / den).astype(o_ref.dtype)


# ----------------------------------------------------------------------------- wrappers

def _dot_attention_batch(hidden, w_scaled, mask_i8, *, target, cap, scoped_budget):
    B, S, D = hidden.shape
    row_padded = _round_up(S, 8) * _round_up(D, 128) * 4
    TB = _choose_batch_tile(B, row_padded, target=target, cap=cap)
    need = _batch_vmem_need(TB, S, D)
    vmem_limit = int(min(scoped_budget, max(8 << 20, 2 * need + (2 << 20))))

    mask3 = mask_i8.reshape(B, 1, S)      # free view; keeps TB out of the (8,128) sublane rule
    out3 = pl.pallas_call(
        _dot_attention_kernel,
        out_shape=jax.ShapeDtypeStruct((B, 1, S), jnp.float32),
        grid_spec=pltpu.PrefetchScalarGridSpec(
            num_scalar_prefetch=0,
            grid=(B // TB,),
            in_specs=[
                pl.BlockSpec((TB, S, D), lambda b: (b, 0, 0)),      # hidden, native layout
                pl.BlockSpec((1, D), lambda b: (0, 0)),             # weight, shared
                pl.BlockSpec((TB, 1, S), lambda b: (b, 0, 0)),      # int8 mask
            ],
            out_specs=pl.BlockSpec((TB, 1, S), lambda b: (b, 0, 0)),
        ),
        compiler_params=pltpu.CompilerParams(
            dimension_semantics=("parallel",),      # batch steps shard across TCs (v7x megacore)
            vmem_limit_bytes=vmem_limit,
        ),
    )(hidden, w_scaled, mask3)
    return out3.reshape(B, S)


def _dot_attention_seq(hidden, w_scaled, mask_i8, TS, *, scoped_budget):
    B, S, D = hidden.shape
    n_s = S // TS
    need = _seq_vmem_need(TS, n_s, D)
    vmem_limit = int(min(scoped_budget, max(8 << 20, 2 * need + (2 << 20))))

    # (B, S) -> (B*n_s, 1, TS): row-major, so flat row b*n_s + j holds positions j*TS..j*TS+TS-1.
    mask3 = mask_i8.reshape(B * n_s, 1, TS)
    out3 = pl.pallas_call(
        _dot_attention_seq_kernel,
        out_shape=jax.ShapeDtypeStruct((B * n_s, 1, TS), jnp.float32),
        grid_spec=pltpu.PrefetchScalarGridSpec(
            num_scalar_prefetch=0,
            grid=(B, n_s),
            in_specs=[
                pl.BlockSpec((1, TS, D), lambda b, s: (b, s, 0)),        # hidden chunk
                pl.BlockSpec((1, D), lambda b, s: (0, 0)),               # weight, shared
                pl.BlockSpec((n_s, 1, TS), lambda b, s: (b, 0, 0)),      # full-row mask (int8)
            ],
            out_specs=pl.BlockSpec((n_s, 1, TS), lambda b, s: (b, 0, 0)),  # resident across s
            scratch_shapes=[pltpu.VMEM((n_s, 1, TS), jnp.float32)],        # raw scores, one row
        ),
        compiler_params=pltpu.CompilerParams(
            dimension_semantics=("parallel", "arbitrary"),
            vmem_limit_bytes=vmem_limit,
        ),
    )(hidden, w_scaled, mask3)
    return out3.reshape(B, S)


def dot_attention(hidden, weight, mask, *, force_path=None):
    """hidden: (B, S, D) f32; weight: (1, D) f32; mask: (B, S), nonzero => masked out.
    Returns softmax attention weights (B, S) f32."""
    B, S, D = hidden.shape
    # Fold the 1/sqrt(hidden.shape[-1]) score scale into the tiny weight once, wrapper-side.
    w_scaled = (weight.astype(jnp.float32) / jnp.sqrt(jnp.float32(D))).reshape(1, D)
    mask_i8 = (mask != 0).astype(jnp.int8)            # 4x less mask HBM traffic than int32

    target, cap, scoped_budget = _generation_block_budget()
    row_padded = _round_up(S, 8) * _round_up(D, 128) * 4   # one padded batch row of hidden in VMEM

    # Sequence-blocked path when a single batch row blows the block cap (long S / big D) or
    # when B == 1 (the batch axis alone cannot give >= 2 pipelined grid steps).
    ts = None
    if force_path != "batch" and (force_path == "seq" or row_padded > cap or B == 1):
        ts = _choose_seq_tile(S, _round_up(D, 128) * 4, target=target, cap=cap)
    if ts is not None:
        return _dot_attention_seq(hidden, w_scaled, mask_i8, ts, scoped_budget=scoped_budget)

    # TODO(synk): rows that exceed the cap but whose S has no multiple-of-8 divisor fall through
    # to the whole-row path below and may exhaust scoped VMEM on extreme shapes.
    return _dot_attention_batch(hidden, w_scaled, mask_i8,
                                target=target, cap=cap, scoped_budget=scoped_budget)


# ----------------------------------------------------------------------------- demo / check

if __name__ == "__main__":
    key = jax.random.PRNGKey(0)
    k_h, k_w, k_m, k_h2, k_m2 = jax.random.split(key, 5)

    batch, seq, hidden_dim = 8, 16, 16
    D = hidden_dim * 2                                # nn.Linear(hidden_dim*2, 1) input dim

    hidden = jax.random.normal(k_h, (batch, seq, D), dtype=jnp.float32)

    # deterministic init matching nn.Linear(hidden_dim*2, 1, bias=False).weight.uniform_(-stdv, stdv)
    stdv = 1.0 / math.sqrt(D)
    weight = jax.random.uniform(k_w, (1, D), minval=-stdv, maxval=stdv, dtype=jnp.float32)

    # boolean mask (nonzero = masked); keep at least one unmasked position per row
    # (a fully-masked row yields NaN, matching PyTorch masked_fill(-inf)+softmax).
    mask = (jax.random.uniform(k_m, (batch, seq)) > 0.6).astype(jnp.int32)
    mask = mask.at[:, 0].set(0)

    out = jax.block_until_ready(dot_attention(hidden, weight, mask))

    # pure-JAX reference
    scores_ref = (hidden @ weight.T).squeeze(-1) / (D ** 0.5)
    scores_ref = jnp.where(mask != 0, -jnp.inf, scores_ref)
    ref = jax.nn.softmax(scores_ref, axis=-1)

    assert out.shape == (batch, seq)
    assert jnp.allclose(out, ref, atol=1e-5, rtol=1e-5)
    assert jnp.allclose(out.sum(-1), jnp.ones((batch,), jnp.float32), atol=1e-5)

    # Also exercise the sequence-blocked (long-row fallback) path at a small shape.
    b2, s2 = 2, 64
    hidden2 = jax.random.normal(k_h2, (b2, s2, D), dtype=jnp.float32)
    mask2 = (jax.random.uniform(k_m2, (b2, s2)) > 0.6).astype(jnp.int32)
    mask2 = mask2.at[:, 0].set(0)
    out2 = jax.block_until_ready(dot_attention(hidden2, weight, mask2, force_path="seq"))

    scores2 = (hidden2 @ weight.T).squeeze(-1) / (D ** 0.5)
    scores2 = jnp.where(mask2 != 0, -jnp.inf, scores2)
    ref2 = jax.nn.softmax(scores2, axis=-1)
    assert out2.shape == (b2, s2)
    assert jnp.allclose(out2, ref2, atol=1e-5, rtol=1e-5)
    assert jnp.allclose(out2.sum(-1), jnp.ones((b2,), jnp.float32), atol=1e-5)

    print("KERNEL_OK")
</pallas_src>

<mosaic_0001>
module attributes {stable_mosaic.version = 11 : i64} {
  func.func @_dot_attention_kernel(%arg0: i32, %arg1: memref<2x16x32xf32, #tpu.memory_space<vmem>>, %arg2: memref<1x32xf32, #tpu.memory_space<vmem>>, %arg3: memref<2x1x16xi8, #tpu.memory_space<vmem>>, %arg4: memref<2x1x16xf32, #tpu.memory_space<vmem>>) attributes {dimension_semantics = [#tpu.dimension_semantics<parallel>], iteration_bounds = array<i64: 4>, scalar_prefetch = 0 : i64, scratch_operands = 0 : i64, tpu.core_type = #tpu.core_type<tc>, window_params = [{transform_indices = @transform_0, window_bounds = array<i64: 2, 16, 32>}, {pipeline_mode = #tpu.pipeline_mode<synchronous>, transform_indices = @transform_1, window_bounds = array<i64: 1, 32>}, {transform_indices = @transform_2, window_bounds = array<i64: 2, 1, 16>}, {transform_indices = @transform_3, window_bounds = array<i64: 2, 1, 16>}]} {
    %c0 = arith.constant 0 : index
    %c0_0 = arith.constant 0 : index
    %c0_1 = arith.constant 0 : index
    %0 = vector.load %arg1[%c0, %c0_0, %c0_1] : memref<2x16x32xf32, #tpu.memory_space<vmem>>, vector<2x16x32xf32>
    %c0_2 = arith.constant 0 : index
    %c0_3 = arith.constant 0 : index
    %1 = vector.load %arg2[%c0_2, %c0_3] : memref<1x32xf32, #tpu.memory_space<vmem>>, vector<1x32xf32>
    %2 = vector.shape_cast %1 : vector<1x32xf32> to vector<1x1x32xf32>
    %3 = vector.broadcast %2 : vector<1x1x32xf32> to vector<2x16x32xf32>
    %4 = arith.mulf %0, %3 : vector<2x16x32xf32>
    %cst = arith.constant dense<0.000000e+00> : vector<2x16xf32>
    %5 = vector.multi_reduction <add>, %4, %cst [2] : vector<2x16x32xf32> to vector<2x16xf32>
    %6 = vector.shape_cast %5 : vector<2x16xf32> to vector<2x1x16xf32>
    %c0_4 = arith.constant 0 : index
    %c0_5 = arith.constant 0 : index
    %c0_6 = arith.constant 0 : index
    %7 = vector.load %arg3[%c0_4, %c0_5, %c0_6] : memref<2x1x16xi8, #tpu.memory_space<vmem>>, vector<2x1x16xi8>
    %8 = arith.sitofp %7 : vector<2x1x16xi8> to vector<2x1x16xf32>
    %cst_7 = arith.constant 0.000000e+00 : f32
    %9 = vector.broadcast %cst_7 : f32 to vector<2x1x16xf32>
    %10 = arith.cmpf one, %8, %9 : vector<2x1x16xf32>
    %cst_8 = arith.constant 0xFF800000 : f32
    %11 = vector.broadcast %cst_8 : f32 to vector<2x1x16xf32>
    %12 = arith.select %10, %11, %6 : vector<2x1x16xi1>, vector<2x1x16xf32>
    %cst_9 = arith.constant dense<0xFF800000> : vector<2x1xf32>
    %13 = vector.multi_reduction <maximumf>, %12, %cst_9 [2] : vector<2x1x16xf32> to vector<2x1xf32>
    %14 = vector.shape_cast %13 : vector<2x1xf32> to vector<2x1x1xf32>
    %15 = vector.broadcast %14 : vector<2x1x1xf32> to vector<2x1x16xf32>
    %16 = arith.subf %12, %15 : vector<2x1x16xf32>
    %17 = math.exp %16 : vector<2x1x16xf32>
    %cst_10 = arith.constant dense<0.000000e+00> : vector<2x1xf32>
    %18 = vector.multi_reduction <add>, %17, %cst_10 [2] : vector<2x1x16xf32> to vector<2x1xf32>
    %19 = vector.shape_cast %18 : vector<2x1xf32> to vector<2x1x1xf32>
    %20 = vector.broadcast %19 : vector<2x1x1xf32> to vector<2x1x16xf32>
    %21 = arith.divf %17, %20 : vector<2x1x16xf32>
    %c0_11 = arith.constant 0 : index
    %c0_12 = arith.constant 0 : index
    %c0_13 = arith.constant 0 : index
    %22 = vector.load %arg4[%c0_11, %c0_12, %c0_13] : memref<2x1x16xf32, #tpu.memory_space<vmem>>, vector<2x1x16xf32>
    tpu.vector_store %arg4[%c0_11, %c0_12, %c0_13], %21 {strides = array<i32>} : memref<2x1x16xf32, #tpu.memory_space<vmem>>, vector<2x1x16xf32>,
    return
  }
  func.func @transform_0(%arg0: i32) -> (i32, i32, i32) {
    %c0_i32 = arith.constant 0 : i32
    %c0_i32_0 = arith.constant 0 : i32
    %c0_i32_1 = arith.constant 0 : i32
    return %arg0, %c0_i32, %c0_i32_0 : i32, i32, i32
  }
  func.func @transform_1(%arg0: i32) -> (i32, i32) {
    %c0_i32 = arith.constant 0 : i32
    %c0_i32_0 = arith.constant 0 : i32
    %c0_i32_1 = arith.constant 0 : i32
    return %c0_i32, %c0_i32_0 : i32, i32
  }
  func.func @transform_2(%arg0: i32) -> (i32, i32, i32) {
    %c0_i32 = arith.constant 0 : i32
    %c0_i32_0 = arith.constant 0 : i32
    %c0_i32_1 = arith.constant 0 : i32
    return %arg0, %c0_i32, %c0_i32_0 : i32, i32, i32
  }
  func.func @transform_3(%arg0: i32) -> (i32, i32, i32) {
    %c0_i32 = arith.constant 0 : i32
    %c0_i32_0 = arith.constant 0 : i32
    %c0_i32_1 = arith.constant 0 : i32
    return %arg0, %c0_i32, %c0_i32_0 : i32, i32, i32
  }
}

</mosaic_0001>

<bundles_post_ra>
// kernel: tpu_custom_call.1
= control target key start
LH: loop header
LB: loop body
LE: loop exit
PB: predicated region body
PF: predicated region fallthrough
CT: control target
= control target key end

     0   :  { %8 = vsyncpa [#allocation3], 0  ;;  %s856_s0 = inlined_call_operand.hbm [shape: f32[8,16,32], index: 0, kind: input, shape index: {}]   ;;  %s857_s1 = inlined_call_operand.vmem [shape: f32[1,32], index: 1, kind: input, shape index: {}]   ;;  %s858_s2 = inlined_call_operand.vmem [shape: s8[8,1,16], index: 2, kind: input, shape index: {}]   ;;  %s859_s3 = inlined_call_operand.hbm [shape: f32[8,1,16], index: 3, kind: output, shape index: {}]  }
   0x1   :  { %10 = vsyncpa [#allocation3 + $0x1], 0 }
   0x2   :  { %11 = vsyncpa [#allocation4], 0 }
   0x3   :  { %13 = vsyncpa [#allocation4 + $0x1], 0  ;;  %s680_s12 = smov 0   ;;  %s682_s13 = smov 0  }
   0x4   :  { %s684_s14 = smov 0   ;;  %s686_s15 = smov 0  }
   0x5 LB: > { %s701_s16 = sadd.s32 4294967295, %s649_s15   ;;  %s470_s17 = sadd.s32 4294967294, %s649_s15   ;;  %s649_s15 = sphi %s686_s15, %s871_s15   ;;  %s645_s14 = sphi %s684_s14, %s870_s14   ;;  %s641_s13 = sphi %s682_s13, %s869_s13   ;;  %s637_s12 = sphi %s680_s12, %s868_s12  }
   0x6   : > { %s705_s18 = sadd.s32 1, %s649_s15   ;;  %s26_s19 = sadd.s32 1, %s645_s14 }
   0x7   : > { %s23_s20 = ssub.s32 %s649_s15, %s705_s18  ;;  %p33_p0 = scmp.ne.s32.totalorder %s645_s14, %s641_s13 }
   0x8   : > { %p24_p1 = scmp.eq.s32.totalorder %s23_s20, 0  ;;  %p34_p2 = scmp.eq.s32.totalorder %s649_s15, 0 }
   0x9   : > { %p39_p3 = scmp.ne.s32.totalorder %s641_s13, %s637_s12  ;;  %p40_p4 = scmp.eq.s32.totalorder %s701_s16, 0 }
   0xa   : > { %s717_s21 = scalar_select %p24_p1, %s645_s14, %s26_s19  }
   0xb   : > { %p719_p5 = por %p34_p2, %p33_p0  ;;  %p723_p6 = por %p40_p4, %p39_p3 }
   0xc   : > { %p110_p7 = scmp.eq.s32.totalorder %s701_s16, 3  ;;  %p116_p8 = scmp.eq.s32.totalorder %s470_s17, 3 }
   0xd   : > { %p502_p9 = scmp.lt.s32.totalorder %s649_s15, 4  ;;  %s139_s26 = sand.u32 1, %s645_s14  }
   0xe   : > { %p729_p10 = por %p110_p7, %p33_p0  ;;  %p733_p11 = por %p116_p8, %p39_p3 }
   0xf   : > { %s488_s27 = sshll.u32 %s649_s15, 9  ;;  %s473_s28 = sshll.u32 %s139_s26, 5 }
  0x10   : > { %s863_s24 = scalar_select %p729_p10, 1, 0 }
  0x11   : > { %s864_s25 = scalar_select %p733_p11, 1, 0 }
  0x12   : > { %s742_s4 = scalar_lea.hbm %s856_s0, %s488_s27  ;;  %s143_s5 = scalar_lea.vmem [#allocation2], %s473_s28 }
  0x13   : > { %s151_s6 = sshll.u32 %s143_s5, 4  ;;  %p746_p12 = pnand %p502_p9, %p719_p5  ;;  %s750_s6 = int_to_ptr.vmem [resolvable:$true] %s151_s6 }
  0x14   : > { %s752_s8 = scalar_lea.sflag [#allocation3], %s139_s26  ;;  %s553_s9 = scalar_lea.hbm %s742_s4, 512 }
  0x15   : > { %p554_p13 = scmp.ne.s32.totalorder %s742_s4, %s553_s9  ;;  %p555_p0 = pneg %p746_p12 }
  0x16   : > { %s558_s17 = scalar_lea.hbm %s856_s0, 2048  ;;  %p559_p3 = scmp.lt.u32.totalorder %s742_s4, %s856_s0 }
  0x17   : > { %p556_p1 = pnand %p555_p0, %p554_p13  ;;  %p560_p4 = scmp.lt.u32.totalorder %s558_s17, %s553_s9 }
  0x18   : > { %p562_p7 = scmp.lt.u32.totalorder %s553_s9, %s742_s4 }
  0x19   : > { %p557_p2 = pneg %p556_p1  ;;  %p561_p5 = por %p560_p4, %p559_p3 }
  0x1b   : > { %p563_p8 = por %p562_p7, %p561_p5 }
  0x1d   : > { %p564_p9 = pnand %p563_p8, %p557_p2 }
  0x1f   : > { %567 = shalt.err (!%p564_p9)
}
  0x20   : > { %s568_s22 = scalar_lea.vmem %s750_s6, 512  ;;  %s651_s26 = smov [#allocation2]  }
  0x21   : > { %p569_p13 = scmp.ne.s32.totalorder %s750_s6, %s568_s22  ;;  %s573_s27 = sshll.u32 %s651_s26, 4  ;;  %s574_s27 = int_to_ptr.vmem [resolvable:$false] %s573_s27 }
  0x22   : > { %s575_s28 = scalar_lea.vmem %s574_s27, 1024  ;;  %p576_p10 = scmp.lt.s32.totalorder %s750_s6, %s574_s27 }
  0x23   : > { %p571_p1 = pnand %p569_p13, %p555_p0  ;;  %p577_p3 = scmp.lt.s32.totalorder %s575_s28, %s568_s22 }
  0x25   : > { %p572_p11 = pneg %p571_p1  ;;  %p578_p4 = por %p577_p3, %p576_p10 }
  0x27   : > { %p579_p5 = pnand %p578_p4, %p572_p11 }
  0x29   : > { %582 = shalt.err (!%p579_p5)
}
  0x2a   : > { %s652_s29 = smov 128   ;;  %s653_s30 = smov 8  }
  0x2b   : > { %497 = dma.hbm_to_vmem [thread:$0]  (!%p746_p12), %s742_s4, 512, %s750_s6, %s752_s8, %s652_s29, %s652_s29, %s653_s30  }
  0x2c   : > { %p477_p0 = scmp.ge.s32.totalorder %s649_s15, 1  ;;  %p167_p2 = scmp.lt.s32.totalorder %s649_s15, 5 }
  0x2e   : > { %p168_p7 = pnand %p477_p0, %p167_p2 }
  0x2f   : > { %s783_s5 = sand.u32 (!%p168_p7), 1, %s641_s13  }
  0x30   : > { %171 = sbr.rel (%p168_p7) target bundleno = 680 (0x2a8), region = 32  ;;  %s478_s9 = sshll.u32 (!%p168_p7), %s783_s5, 5 }
  0x31   : > { %s174_s10 = scalar_lea.sflag (!%p168_p7), [#allocation3], %s783_s5  ;;  %s177_s11 = scalar_lea.vmem (!%p168_p7), [#allocation2], %s478_s9 }
  0x37   : > { %628 = dma.done.wait (%p723_p6), %s174_s10, 512  }
  0x38   : > { %630 = vsyncadd (%p723_p6), %s174_s10, 4294966784  ;;  %v211_v0 = vld [vmem:[%s177_s11] sm:$0xff]  ;;  %vm226_vm0 = vcmask 261120   ;;  %v212_v2 = vld [vmem:[%s177_s11 + $0x8] sm:$0xff]  ;;  %v654_v13 = vmov 0   ;;  %v254_v16 = vlaneseq  ;;  %s480_s23 = sshll.u32 %s701_s16, 1 }
  0x39   : > { %v481_v1 = vld [vmem:[%s857_s1] ss:$0 sm:$0xff]  ;;  %v213_v5 = vld [vmem:[%s177_s11 + $0x10] sm:$0xff]  ;;  %v214_v6 = vld [vmem:[%s177_s11 + $0x18] sm:$0xff]  ;;  %543 = vset.pattern.permute.xlu0 %v654_v13  ;;  %544 = vset.pattern.permute.xlu1 %v654_v13  ;;  %v655_v14 = vmov 839922192  }
  0x3a   : > { %v222_v3 = vmul.f32 %v481_v1, %v211_v0  ;;  %v223_v4 = vmul.f32 %v481_v1, %v212_v2  ;;  %v224_v7 = vmul.f32 %v481_v1, %v213_v5  ;;  %v225_v8 = vmul.f32 %v481_v1, %v214_v6  ;;  %p206_p6 = scmp.lt.s32.totalorder %s480_s23, 7  ;;  %s479_s19 = sshll.u32 %s783_s5, 1 }
  0x3b   : > { %v252_v15 = vunpack.c.l.s4 %v655_v14  ;;  %v656_v17 = vmov 1985246804   ;;  %v255_v20 = vshrl.u32 %v254_v16, 7  ;;  %v324_v41 = vand.u32 127, %v254_v16  ;;  %s203_s20 = scalar_lea.vmem [#allocation5], %s479_s19  ;;  %s489_s22 = sshll.u32 %s701_s16, 5 }
  0x3c   : > { %v227_v9 = vsel %vm226_vm0, %v222_v3, 0.0  ;;  %v233_v10 = vsel %vm226_vm0, %v224_v7, 0.0  ;;  %v230_v11 = vsel %vm226_vm0, %v223_v4, 0.0  ;;  %v236_v12 = vsel %vm226_vm0, %v225_v8, 0.0  ;;  %s873_s23 = smov (!%p206_p6, %s480_s23), 7  ;;  %s388_s26 = sshll.u32 %s203_s20, 4  ;;  %s812_s26 = int_to_ptr.vmem [resolvable:$true] %s388_s26 }
  0x3d   : > { %228 = vadd.xlane.f32.xlu0 %v227_v9  ;;  %234 = vadd.xlane.f32.xlu1 %v233_v10  ;;  %v259_v18 = vunpack.c.l.s4 %v656_v17  ;;  %v253_v19 = vunpack.c.0.s8 %v252_v15  ;;  %s208_s17 = scalar_lea.vmem %s858_s2, %s873_s23  ;;  %v329_v42 = vadd.s32 4294967288, %v324_v41  ;;  %v327_v44 = vsub.s32 %v324_v41, %v255_v20  ;;  %s810_s29 = scalar_lea.hbm %s859_s3, %s489_s22 }
  0x3e   : > { %v239_v40 = vld [vmem:[%s208_s17] sm:$0x1]  ;;  %v240_v48 = vld [vmem:[%s208_s17 + $0x1] sm:$0x1]  ;;  %vm334_vm1 = vcmask 130112   ;;  %vm349_vm3 = vcmask 122880  }
  0x3f   : > { %v260_v21 = vunpack.c.0.s8 %v259_v18  ;;  %v256_v22 = vsub.s32 %v253_v19, %v255_v20  ;;  %v241_v43 = vunpack.c.0.s8 %v239_v40  ;;  %v332_v45 = vsub.s32 %v329_v42, %v255_v20  ;;  %s375_s30 = scalar_lea.sflag [#allocation4], %s783_s5  ;;  %s583_s9 = scalar_lea.vmem %s812_s26, 32 }
  0x40   : > { %v242_v52 = vunpack.c.0.s8 %v240_v48  ;;  %p584_p10 = scmp.ne.s32.totalorder %s812_s26, %s583_s9  ;;  %p866_p11 = scmp.ne.s32.totalorder %s863_s24, 0 }
  0x41   : > { %231 = vadd.xlane.f32.xlu0 %v230_v11  ;;  %237 = vadd.xlane.f32.xlu1 %v236_v12  ;;  %v263_v23 = vsub.s32 %v260_v21, %v255_v20  ;;  %v243_v46 = vcvt.s32.f32 %v241_v43  ;;  %s657_s16 = smov [#allocation5]  }
  0x42   : > { %v244_v57 = vcvt.s32.f32 %v242_v52  ;;  %p585_p12 = pnand %p584_p10, %p866_p11  ;;  %s587_s10 = sshll.u32 %s657_s16, 4  ;;  %s588_s10 = int_to_ptr.vmem [resolvable:$false] %s587_s10 }
  0x43   : > { %vm245_vm2 = vcmp.ne.f32.partialorder %v243_v46, 0.0  ;;  %s589_s11 = scalar_lea.vmem %s588_s10, 64  ;;  %p590_p9 = scmp.lt.s32.totalorder %s812_s26, %s588_s10 }
  0x44   : > { %vm246_vm4 = vcmp.ne.f32.partialorder %v244_v57, 0.0  ;;  %p586_p8 = pneg %p585_p12  ;;  %p591_p13 = scmp.lt.s32.totalorder %s589_s11, %s583_s9 }
  0x46   : > { %p592_p1 = por %p591_p13, %p590_p9 }
  0x48   : > { %p593_p3 = pnand %p592_p1, %p586_p8 }
  0xca   : > { %v229_v24 = vpop.xlane.xlu0 %228  ;;  %v235_v27 = vpop.xlane.xlu1 %234 }
  0xcb   : > { %v257_v25 = vrot.slane %v229_v24, %v256_v22  ;;  %v264_v26 = vrot.slane %v229_v24, %v263_v23  ;;  %v285_v32 = vrot.slane %v235_v27, %v256_v22  ;;  %v292_v33 = vrot.slane %v235_v27, %v263_v23 }
  0xcd   : > { %v307_v28 = vcombine.low %v257_v25, %v264_v26  ;;  %v309_v36 = vcombine.low %v285_v32, %v292_v33 }
  0xce   : > { %v232_v29 = vpop.xlane.xlu0 %231  ;;  %v238_v34 = vpop.xlane.xlu1 %237 }
  0xcf   : > { %v271_v30 = vrot.slane %v232_v29, %v256_v22  ;;  %v278_v31 = vrot.slane %v232_v29, %v263_v23  ;;  %312 = vperm.xlu0 %543, %v307_v28   ;;  %v299_v37 = vrot.slane %v238_v34, %v256_v22  ;;  %v306_v38 = vrot.slane %v238_v34, %v263_v23 }
  0xd1   : > { %v308_v35 = vcombine.low %v271_v30, %v278_v31  ;;  %v310_v39 = vcombine.low %v299_v37, %v306_v38 }
  0xd3   : > { %315 = vperm.xlu1 %544, %v308_v35  }
  0xd7   : > { %318 = vperm.xlu1 %544, %v309_v36  }
  0xdb   : > { %321 = vperm.xlu1 %544, %v310_v39  }
 0x14e   : > { %v313_v47 = vpop.permute.xlu0 %312 }
 0x14f   : > { %v328_v50 = vrot.slane %v313_v47, %v327_v44 }
 0x152   : > { %v316_v49 = vpop.permute.xlu1 %315 }
 0x153   : > { %v333_v51 = vrot.slane %v316_v49, %v332_v45 }
 0x155   : > { %v335_v53 = vsel %vm334_vm1, %v333_v51, %v328_v50 }
 0x156   : > { %v319_v54 = vpop.permute.xlu1 %318  ;;  %v347_v55 = vsel %vm245_vm2, -inf, %v335_v53 }
 0x157   : > { %v350_v56 = vsel %vm349_vm3, %v347_v55, -inf  ;;  %v339_v59 = vrot.slane %v319_v54, %v327_v44 }
 0x158   : > { %351 = vmax.xlane.f32.xlu1 %v350_v56 }
 0x15a   : > { %v322_v58 = vpop.permute.xlu1 %321 }
 0x15b   : > { %v343_v60 = vrot.slane %v322_v58, %v332_v45 }
 0x15d   : > { %v344_v61 = vsel %vm334_vm1, %v343_v60, %v339_v59 }
 0x15e   : > { %v348_v62 = vsel %vm246_vm4, -inf, %v344_v61 }
 0x15f   : > { %v353_v63 = vsel %vm349_vm3, %v348_v62, -inf }
 0x160   : > { %354 = vmax.xlane.f32.xlu0 %v353_v63 }
 0x1e5   : > { %v352_v0 = vpop.xlane.xlu1 %351 }
 0x1e6   : > { %v356_v1 = vsub.f32 %v347_v55, %v352_v0 }
 0x1e8   : > { %v358_v2 = vmul.f32 1.442695, %v356_v1 }
 0x1ea   : > { %545 = vpow2.f32 %v358_v2 }
 0x1ed   : > { %v355_v3 = vpop.xlane.xlu0 %354 }
 0x1ee   : > { %v357_v4 = vsub.f32 %v348_v62, %v355_v3 }
 0x1f0   : > { %v360_v5 = vmul.f32 1.442695, %v357_v4 }
 0x1f2   : > { %547 = vpow2.f32 %v360_v5 }
 0x1f4   : > { %v546_v6 = vpop.eup %545 }
 0x1f5   : > { %v362_v7 = vsel %vm349_vm3, %v546_v6, 0.0 }
 0x1f6   : > { %363 = vadd.xlane.f32.xlu1 %v362_v7 }
 0x1fc   : > { %v548_v8 = vpop.eup %547 }
 0x1fd   : > { %v365_v9 = vsel %vm349_vm3, %v548_v8, 0.0 }
 0x1fe   : > { %366 = vadd.xlane.f32.xlu1 %v365_v9 }
 0x283   : > { %v364_v10 = vpop.xlane.xlu1 %363 }
 0x284   : > { %549 = vrcp.f32 %v364_v10 }
 0x28b   : > { %v367_v11 = vpop.xlane.xlu1 %366 }
 0x28c   : > { %551 = vrcp.f32 %v367_v11 }
 0x28e   : > { %v550_v12 = vpop.eup %549 }
 0x28f   : > { %v369_v13 = vmul.f32 %v550_v12, %v546_v6 }
 0x291   : > { %372 = vst.msk [vmem:[%s203_s20] sm:$0x1] %vm349_vm3, %v369_v13 }
 0x296   : > { %v552_v14 = vpop.eup %551 }
 0x297   : > { %v371_v15 = vmul.f32 %v552_v14, %v548_v8 }
 0x299   : > { %373 = vst.msk [vmem:[%s203_s20 + $0x1] sm:$0x1] %vm349_vm3, %v371_v15 }
 0x29a   : > { %596 = shalt.err (!%p593_p3)
}
 0x29b   : > { %s597_s4 = scalar_lea.hbm %s810_s29, 32  ;;  %s601_s7 = scalar_lea.hbm %s859_s3, 128 }
 0x29c   : > { %p598_p4 = scmp.ne.s32.totalorder %s810_s29, %s597_s4  ;;  %p602_p2 = scmp.lt.u32.totalorder %s810_s29, %s859_s3 }
 0x29d   : > { %p603_p7 = scmp.lt.u32.totalorder %s601_s7, %s597_s4  ;;  %p605_p10 = scmp.lt.u32.totalorder %s597_s4, %s810_s29 }
 0x29e   : > { %p599_p5 = pnand %p598_p4, %p866_p11 }
 0x29f   : > { %p604_p6 = por %p603_p7, %p602_p2 }
 0x2a0   : > { %p600_p0 = pneg %p599_p5 }
 0x2a1   : > { %p606_p12 = por %p605_p10, %p604_p6 }
 0x2a3   : > { %p607_p8 = pnand %p606_p12, %p600_p0 }
 0x2a5   : > { %610 = shalt.err (!%p607_p8)
}
 0x2a6   : > { %s658_s19 = smov 16   ;;  %s659_s20 = smov 1  }
 0x2a7   : > { %492 = dma.vmem_to_hbm [thread:$0]  (%p866_p11), %s812_s26, 32, %s810_s29, %s375_s30, %s658_s19, %s658_s19, %s659_s20  }
 0x2a8 PF: > { %p503_p9 = scmp.ge.s32.totalorder %s649_s15, 2  ;;  %s403_s22 = sand.u32 1, %s637_s12  }
 0x2a9   : > { %p867_p13 = scmp.ne.s32.totalorder %s864_s25, 0  ;;  %s404_s27 = scalar_lea.sflag [#allocation4], %s403_s22 }
 0x2ab   : > { %p499_p1 = pnand %p503_p9, %p867_p13 }
 0x2ad   : > { %632 = dma.done.wait (!%p499_p1), %s404_s27, 32  }
 0x2ae   : > { %634 = vsyncadd (!%p499_p1), %s404_s27, 4294967264  ;;  %p16_p3 = scmp.ge.s32.totalorder %s705_s18, 6   ;;  %s868_s12 = smov %s641_s13 }
 0x2af   : > { %s869_s13 = smov %s645_s14  ;;  %s870_s14 = smov %s717_s21 }
 0x2b0   : > { %s871_s15 = smov %s705_s18  ;;  %18 = sbr.rel (!%p16_p3) target bundleno = 5 (0x5), region = 80 }
 0x2b7   :  { %409 = vsyncpa [#allocation3], 1 }
 0x2b8   :  { %411 = vsyncpa [#allocation3 + $0x1], 1 }
 0x2b9   :  { %412 = vsyncpa [#allocation4], 1 }
 0x2ba   :  { %414 = vsyncpa [#allocation4 + $0x1], 1 }

</bundles_post_ra>
